<compile_context>
chip_gen: v7x
topology: tpu7x:2x2x1
jax: 0.10.0
libtpu: 0.0.40
codegen_flags: <defaults>
</compile_context>

<pallas_src>
import jax
import jax.numpy as jnp
from jax import lax
from jax.experimental import pallas as pl
from jax.experimental.pallas import tpu as pltpu


def _make_scrn_kernel(alpha: float, seq_len: int):
    one_minus_alpha = 1.0 - alpha

    def kernel(u_ref, wcat_ref, wfc_ref, bfc_ref, out_ref):
        # u_ref:    (T, B, C)  time-major, precomputed alpha*(x_t @ W_x + b_x)
        # wcat_ref: (C+H, H)   concat([U_c, V_h], axis=0), stored as (in, out)
        # wfc_ref:  (H, O)
        # bfc_ref:  (1, O)
        # out_ref:  (B, O)
        _, B, C = u_ref.shape
        H = wcat_ref.shape[1]

        # Hoist weight / bias loads out of the recurrence (no re-broadcast per step).
        w_cat = wcat_ref[...]
        w_fc = wfc_ref[...]
        b_fc = bfc_ref[...]

        def step(t, carry):
            h, c = carry
            # c_t = (1 - alpha) * c_{t-1} + alpha * (x_t @ W_x + b_x)
            c_new = one_minus_alpha * c + u_ref[t]
            # h_t = tanh(c_t @ U_c + h_{t-1} @ V_h), fused into one MXU matmul.
            hc = jnp.concatenate([c_new, h], axis=-1)            # (B, C+H)
            h_new = jnp.tanh(
                jnp.dot(hc, w_cat, preferred_element_type=jnp.float32)
            )
            return h_new, c_new

        h0 = jnp.zeros((B, H), jnp.float32)
        c0 = jnp.zeros((B, C), jnp.float32)
        h_final, _ = lax.fori_loop(0, seq_len, step, (h0, c0), unroll=True)

        out_ref[...] = (
            jnp.dot(h_final, w_fc, preferred_element_type=jnp.float32) + b_fc
        )

    return kernel


def scrn_forward(tokens, emb_table, params, alpha=0.95):
    """tokens: (B, T) int32; emb_table: (V, E); params: weights stored (in, out)."""
    # Embedding lookup is gather-glue; since gather commutes with the linear
    # projection, fold W_x / b_x / alpha into the embedding table once here.
    emb_proj = alpha * (emb_table @ params["wx"] + params["bx"])      # (V, C)
    u = jnp.take(emb_proj, tokens, axis=0)                            # (B, T, C)
    u_tm = jnp.transpose(u, (1, 0, 2)).astype(jnp.float32)            # (T, B, C)

    # Fuse the two recurrent matmuls into one weight.
    w_cat = jnp.concatenate([params["uc"], params["vh"]], axis=0)     # (C+H, H)

    T, B, _ = u_tm.shape
    O = params["wfc"].shape[1]

    # At production sizes: cast matmul operands to bf16 (keep f32 accumulation),
    # pad B to >=8 sublanes / O to a multiple of 128 lanes, budget VMEM against
    # 64 MiB on v7x, and add a leading "parallel" batch grid axis to use both TCs.
    vmem = pl.BlockSpec(memory_space=pltpu.MemorySpace.VMEM)
    out = pl.pallas_call(
        _make_scrn_kernel(alpha, T),
        out_shape=jax.ShapeDtypeStruct((B, O), jnp.float32),
        in_specs=[vmem, vmem, vmem, vmem],
        out_specs=vmem,
    )(u_tm, w_cat, params["wfc"], params["bfc"])
    return out


def scrn_reference(tokens, emb_table, params, alpha=0.95):
    """Pure-JAX reference mirroring the PyTorch forward."""
    embedded = jnp.take(emb_table, tokens, axis=0)  # (B, T, E)
    B, T, _ = embedded.shape
    H = params["uc"].shape[1]
    C = params["wx"].shape[1]
    h = jnp.zeros((B, H), jnp.float32)
    c = jnp.zeros((B, C), jnp.float32)
    for t in range(T):
        x_t = embedded[:, t, :]
        c = (1.0 - alpha) * c + alpha * (x_t @ params["wx"] + params["bx"][0])
        h = jnp.tanh(c @ params["uc"] + h @ params["vh"])
    return h @ params["wfc"] + params["bfc"][0]


if __name__ == "__main__":
    # Small shapes consistent with the module.
    vocab_size = 50
    embed_dim = 16      # input_size
    hidden_size = 32
    context_size = 16
    num_classes = 4
    batch, seq_len = 2, 8
    alpha = 0.95

    key = jax.random.PRNGKey(0)
    keys = jax.random.split(key, 8)

    emb_table = jax.random.normal(keys[0], (vocab_size, embed_dim), jnp.float32) * 0.1
    params = {
        # stored pre-transposed as (in, out)
        "wx":  jax.random.normal(keys[1], (embed_dim, context_size), jnp.float32) * 0.1,
        "bx":  jax.random.normal(keys[2], (1, context_size), jnp.float32) * 0.1,
        "uc":  jax.random.normal(keys[3], (context_size, hidden_size), jnp.float32) * 0.1,
        "vh":  jax.random.normal(keys[4], (hidden_size, hidden_size), jnp.float32) * 0.1,
        "wfc": jax.random.normal(keys[5], (hidden_size, num_classes), jnp.float32) * 0.1,
        "bfc": jax.random.normal(keys[6], (1, num_classes), jnp.float32) * 0.1,
    }
    tokens = jax.random.randint(keys[7], (batch, seq_len), 0, vocab_size, jnp.int32)

    out = scrn_forward(tokens, emb_table, params, alpha)
    out = jax.block_until_ready(out)

    ref = scrn_reference(tokens, emb_table, params, alpha)
    assert out.shape == (batch, num_classes)
    assert jnp.allclose(out, ref, atol=1e-4, rtol=1e-4), "mismatch vs reference"

    print("KERNEL_OK")
</pallas_src>

<mosaic_0001>
module attributes {stable_mosaic.version = 11 : i64} {
  func.func @kernel(%arg0: memref<8x2x16xf32, #tpu.memory_space<vmem>>, %arg1: memref<48x32xf32, #tpu.memory_space<vmem>>, %arg2: memref<32x4xf32, #tpu.memory_space<vmem>>, %arg3: memref<1x4xf32, #tpu.memory_space<vmem>>, %arg4: memref<2x4xf32, #tpu.memory_space<vmem>>) attributes {dimension_semantics = [], scalar_prefetch = 0 : i64, scratch_operands = 0 : i64, tpu.core_type = #tpu.core_type<tc>} {
    %c0 = arith.constant 0 : index
    %c0_0 = arith.constant 0 : index
    %0 = vector.load %arg1[%c0, %c0_0] : memref<48x32xf32, #tpu.memory_space<vmem>>, vector<48x32xf32>
    %c0_1 = arith.constant 0 : index
    %c0_2 = arith.constant 0 : index
    %1 = vector.load %arg2[%c0_1, %c0_2] : memref<32x4xf32, #tpu.memory_space<vmem>>, vector<32x4xf32>
    %c0_3 = arith.constant 0 : index
    %c0_4 = arith.constant 0 : index
    %2 = vector.load %arg3[%c0_3, %c0_4] : memref<1x4xf32, #tpu.memory_space<vmem>>, vector<1x4xf32>
    %cst = arith.constant 0.000000e+00 : f32
    %3 = vector.broadcast %cst : f32 to vector<2x32xf32>
    %cst_5 = arith.constant 0.000000e+00 : f32
    %4 = vector.broadcast %cst_5 : f32 to vector<2x16xf32>
    %c0_i32 = arith.constant 0 : i32
    %cst_6 = arith.constant 5.000000e-02 : f32
    %5 = vector.broadcast %cst_6 : f32 to vector<2x16xf32>
    %6 = arith.mulf %5, %4 : vector<2x16xf32>
    %7 = arith.index_cast %c0_i32 : i32 to index
    %c0_7 = arith.constant 0 : index
    %c0_8 = arith.constant 0 : index
    %8 = vector.load %arg0[%7, %c0_7, %c0_8] : memref<8x2x16xf32, #tpu.memory_space<vmem>>, vector<1x2x16xf32>
    %9 = vector.shape_cast %8 : vector<1x2x16xf32> to vector<2x16xf32>
    %10 = arith.addf %6, %9 : vector<2x16xf32>
    %11 = tpu.concatenate %10, %3 in 1 : vector<2x16xf32>, vector<2x32xf32> -> vector<2x48xf32>
    %cst_9 = arith.constant dense<0.000000e+00> : vector<2x32xf32>
    %12 = tpu.matmul %11, %0, %cst_9 {dimension_numbers = #tpu.dot_dimension_numbers<[1], [0], [0], [1], [0, 0, 1, 1], [], []>} : vector<2x48xf32>, vector<48x32xf32>, vector<2x32xf32> -> vector<2x32xf32>
    %13 = math.tanh %12 : vector<2x32xf32>
    %c1_i32 = arith.constant 1 : i32
    %cst_10 = arith.constant 5.000000e-02 : f32
    %14 = vector.broadcast %cst_10 : f32 to vector<2x16xf32>
    %15 = arith.mulf %14, %10 : vector<2x16xf32>
    %16 = arith.index_cast %c1_i32 : i32 to index
    %c0_11 = arith.constant 0 : index
    %c0_12 = arith.constant 0 : index
    %17 = vector.load %arg0[%16, %c0_11, %c0_12] : memref<8x2x16xf32, #tpu.memory_space<vmem>>, vector<1x2x16xf32>
    %18 = vector.shape_cast %17 : vector<1x2x16xf32> to vector<2x16xf32>
    %19 = arith.addf %15, %18 : vector<2x16xf32>
    %20 = tpu.concatenate %19, %13 in 1 : vector<2x16xf32>, vector<2x32xf32> -> vector<2x48xf32>
    %cst_13 = arith.constant dense<0.000000e+00> : vector<2x32xf32>
    %21 = tpu.matmul %20, %0, %cst_13 {dimension_numbers = #tpu.dot_dimension_numbers<[1], [0], [0], [1], [0, 0, 1, 1], [], []>} : vector<2x48xf32>, vector<48x32xf32>, vector<2x32xf32> -> vector<2x32xf32>
    %22 = math.tanh %21 : vector<2x32xf32>
    %c2_i32 = arith.constant 2 : i32
    %cst_14 = arith.constant 5.000000e-02 : f32
    %23 = vector.broadcast %cst_14 : f32 to vector<2x16xf32>
    %24 = arith.mulf %23, %19 : vector<2x16xf32>
    %25 = arith.index_cast %c2_i32 : i32 to index
    %c0_15 = arith.constant 0 : index
    %c0_16 = arith.constant 0 : index
    %26 = vector.load %arg0[%25, %c0_15, %c0_16] : memref<8x2x16xf32, #tpu.memory_space<vmem>>, vector<1x2x16xf32>
    %27 = vector.shape_cast %26 : vector<1x2x16xf32> to vector<2x16xf32>
    %28 = arith.addf %24, %27 : vector<2x16xf32>
    %29 = tpu.concatenate %28, %22 in 1 : vector<2x16xf32>, vector<2x32xf32> -> vector<2x48xf32>
    %cst_17 = arith.constant dense<0.000000e+00> : vector<2x32xf32>
    %30 = tpu.matmul %29, %0, %cst_17 {dimension_numbers = #tpu.dot_dimension_numbers<[1], [0], [0], [1], [0, 0, 1, 1], [], []>} : vector<2x48xf32>, vector<48x32xf32>, vector<2x32xf32> -> vector<2x32xf32>
    %31 = math.tanh %30 : vector<2x32xf32>
    %c3_i32 = arith.constant 3 : i32
    %cst_18 = arith.constant 5.000000e-02 : f32
    %32 = vector.broadcast %cst_18 : f32 to vector<2x16xf32>
    %33 = arith.mulf %32, %28 : vector<2x16xf32>
    %34 = arith.index_cast %c3_i32 : i32 to index
    %c0_19 = arith.constant 0 : index
    %c0_20 = arith.constant 0 : index
    %35 = vector.load %arg0[%34, %c0_19, %c0_20] : memref<8x2x16xf32, #tpu.memory_space<vmem>>, vector<1x2x16xf32>
    %36 = vector.shape_cast %35 : vector<1x2x16xf32> to vector<2x16xf32>
    %37 = arith.addf %33, %36 : vector<2x16xf32>
    %38 = tpu.concatenate %37, %31 in 1 : vector<2x16xf32>, vector<2x32xf32> -> vector<2x48xf32>
    %cst_21 = arith.constant dense<0.000000e+00> : vector<2x32xf32>
    %39 = tpu.matmul %38, %0, %cst_21 {dimension_numbers = #tpu.dot_dimension_numbers<[1], [0], [0], [1], [0, 0, 1, 1], [], []>} : vector<2x48xf32>, vector<48x32xf32>, vector<2x32xf32> -> vector<2x32xf32>
    %40 = math.tanh %39 : vector<2x32xf32>
    %c4_i32 = arith.constant 4 : i32
    %cst_22 = arith.constant 5.000000e-02 : f32
    %41 = vector.broadcast %cst_22 : f32 to vector<2x16xf32>
    %42 = arith.mulf %41, %37 : vector<2x16xf32>
    %43 = arith.index_cast %c4_i32 : i32 to index
    %c0_23 = arith.constant 0 : index
    %c0_24 = arith.constant 0 : index
    %44 = vector.load %arg0[%43, %c0_23, %c0_24] : memref<8x2x16xf32, #tpu.memory_space<vmem>>, vector<1x2x16xf32>
    %45 = vector.shape_cast %44 : vector<1x2x16xf32> to vector<2x16xf32>
    %46 = arith.addf %42, %45 : vector<2x16xf32>
    %47 = tpu.concatenate %46, %40 in 1 : vector<2x16xf32>, vector<2x32xf32> -> vector<2x48xf32>
    %cst_25 = arith.constant dense<0.000000e+00> : vector<2x32xf32>
    %48 = tpu.matmul %47, %0, %cst_25 {dimension_numbers = #tpu.dot_dimension_numbers<[1], [0], [0], [1], [0, 0, 1, 1], [], []>} : vector<2x48xf32>, vector<48x32xf32>, vector<2x32xf32> -> vector<2x32xf32>
    %49 = math.tanh %48 : vector<2x32xf32>
    %c5_i32 = arith.constant 5 : i32
    %cst_26 = arith.constant 5.000000e-02 : f32
    %50 = vector.broadcast %cst_26 : f32 to vector<2x16xf32>
    %51 = arith.mulf %50, %46 : vector<2x16xf32>
    %52 = arith.index_cast %c5_i32 : i32 to index
    %c0_27 = arith.constant 0 : index
    %c0_28 = arith.constant 0 : index
    %53 = vector.load %arg0[%52, %c0_27, %c0_28] : memref<8x2x16xf32, #tpu.memory_space<vmem>>, vector<1x2x16xf32>
    %54 = vector.shape_cast %53 : vector<1x2x16xf32> to vector<2x16xf32>
    %55 = arith.addf %51, %54 : vector<2x16xf32>
    %56 = tpu.concatenate %55, %49 in 1 : vector<2x16xf32>, vector<2x32xf32> -> vector<2x48xf32>
    %cst_29 = arith.constant dense<0.000000e+00> : vector<2x32xf32>
    %57 = tpu.matmul %56, %0, %cst_29 {dimension_numbers = #tpu.dot_dimension_numbers<[1], [0], [0], [1], [0, 0, 1, 1], [], []>} : vector<2x48xf32>, vector<48x32xf32>, vector<2x32xf32> -> vector<2x32xf32>
    %58 = math.tanh %57 : vector<2x32xf32>
    %c6_i32 = arith.constant 6 : i32
    %cst_30 = arith.constant 5.000000e-02 : f32
    %59 = vector.broadcast %cst_30 : f32 to vector<2x16xf32>
    %60 = arith.mulf %59, %55 : vector<2x16xf32>
    %61 = arith.index_cast %c6_i32 : i32 to index
    %c0_31 = arith.constant 0 : index
    %c0_32 = arith.constant 0 : index
    %62 = vector.load %arg0[%61, %c0_31, %c0_32] : memref<8x2x16xf32, #tpu.memory_space<vmem>>, vector<1x2x16xf32>
    %63 = vector.shape_cast %62 : vector<1x2x16xf32> to vector<2x16xf32>
    %64 = arith.addf %60, %63 : vector<2x16xf32>
    %65 = tpu.concatenate %64, %58 in 1 : vector<2x16xf32>, vector<2x32xf32> -> vector<2x48xf32>
    %cst_33 = arith.constant dense<0.000000e+00> : vector<2x32xf32>
    %66 = tpu.matmul %65, %0, %cst_33 {dimension_numbers = #tpu.dot_dimension_numbers<[1], [0], [0], [1], [0, 0, 1, 1], [], []>} : vector<2x48xf32>, vector<48x32xf32>, vector<2x32xf32> -> vector<2x32xf32>
    %67 = math.tanh %66 : vector<2x32xf32>
    %c7_i32 = arith.constant 7 : i32
    %cst_34 = arith.constant 5.000000e-02 : f32
    %68 = vector.broadcast %cst_34 : f32 to vector<2x16xf32>
    %69 = arith.mulf %68, %64 : vector<2x16xf32>
    %70 = arith.index_cast %c7_i32 : i32 to index
    %c0_35 = arith.constant 0 : index
    %c0_36 = arith.constant 0 : index
    %71 = vector.load %arg0[%70, %c0_35, %c0_36] : memref<8x2x16xf32, #tpu.memory_space<vmem>>, vector<1x2x16xf32>
    %72 = vector.shape_cast %71 : vector<1x2x16xf32> to vector<2x16xf32>
    %73 = arith.addf %69, %72 : vector<2x16xf32>
    %74 = tpu.concatenate %73, %67 in 1 : vector<2x16xf32>, vector<2x32xf32> -> vector<2x48xf32>
    %cst_37 = arith.constant dense<0.000000e+00> : vector<2x32xf32>
    %75 = tpu.matmul %74, %0, %cst_37 {dimension_numbers = #tpu.dot_dimension_numbers<[1], [0], [0], [1], [0, 0, 1, 1], [], []>} : vector<2x48xf32>, vector<48x32xf32>, vector<2x32xf32> -> vector<2x32xf32>
    %76 = math.tanh %75 : vector<2x32xf32>
    %c8_i32 = arith.constant 8 : i32
    %cst_38 = arith.constant dense<0.000000e+00> : vector<2x4xf32>
    %77 = tpu.matmul %76, %1, %cst_38 {dimension_numbers = #tpu.dot_dimension_numbers<[1], [0], [0], [1], [0, 0, 1, 1], [], []>} : vector<2x32xf32>, vector<32x4xf32>, vector<2x4xf32> -> vector<2x4xf32>
    %78 = vector.broadcast %2 : vector<1x4xf32> to vector<2x4xf32>
    %79 = arith.addf %77, %78 : vector<2x4xf32>
    %c0_39 = arith.constant 0 : index
    %c0_40 = arith.constant 0 : index
    %80 = vector.load %arg4[%c0_39, %c0_40] : memref<2x4xf32, #tpu.memory_space<vmem>>, vector<2x4xf32>
    tpu.vector_store %arg4[%c0_39, %c0_40], %79 {strides = array<i32>} : memref<2x4xf32, #tpu.memory_space<vmem>>, vector<2x4xf32>,
    return
  }
}

</mosaic_0001>

<bundles_post_ra>
// kernel: tpu_custom_call.1
= control target key start
LH: loop header
LB: loop body
LE: loop exit
PB: predicated region body
PF: predicated region fallthrough
CT: control target
= control target key end

     0   :  { %v1117_v3 = vmov 0.0|0.0   ;;  %vm1118_vm0 = vmmov 0   ;;  %v1119_v6 = vmov 0.0   ;;  %s1313_s0 = inlined_call_operand.vmem [shape: f32[8,2,16], index: 0, kind: input, shape index: {}]   ;;  %s1314_s1 = inlined_call_operand.vmem [shape: f32[48,32], index: 1, kind: input, shape index: {}]   ;;  %s1315_s2 = inlined_call_operand.vmem [shape: f32[32,4], index: 2, kind: input, shape index: {}]   ;;  %s1316_s3 = inlined_call_operand.vmem [shape: f32[1,4], index: 3, kind: input, shape index: {}]   ;;  %s1317_s4 = inlined_call_operand.hbm [shape: f32[2,4], index: 4, kind: output, shape index: {}]  }
   0x1   :  { %v18_v0 = vld [vmem:[%s1314_s1] sm:$0xff]  ;;  %v19_v1 = vld [vmem:[%s1314_s1 + $0x8] sm:$0xff]  ;;  %v20_v2 = vld [vmem:[%s1314_s1 + $0x10] sm:$0xff]  ;;  %994 = vmatprep.subr.bf16.mxu0 %v1117_v3  ;;  %875 = vmatprep.mubr.msk.f32.mxu0 %vm1118_vm0, %v1119_v6 }
   0x2   :  { %v1157_v4 = vpack.c.bf16 %v19_v1, %v18_v0  ;;  %v21_v5 = vld [vmem:[%s1314_s1 + $0x18] sm:$0xff]  ;;  %1003 = vmatprep.subr.bf16.mxu1 %v1117_v3  ;;  %890 = vmatprep.mubr.msk.f32.mxu1 %vm1118_vm0, %v1119_v6 }
   0x3   :  { %9 = vsyncpa [#allocation3], 0  ;;  %v1168_v7 = vpack.c.bf16 %v21_v5, %v20_v2  ;;  %v22_v8 = vld [vmem:[%s1314_s1 + $0x20] sm:$0xff]  ;;  %v23_v9 = vld [vmem:[%s1314_s1 + $0x28] sm:$0xff]  ;;  %vm31_vm1 = vcmask 130048   ;;  %vm33_vm2 = vcmask 392192  }
   0x4   :  { %996 = vmatpush3.bf16.msra.mxu0 %v1157_v4  ;;  %1005 = vmatpush3.bf16.msra.mxu1 %v1157_v4  ;;  %v1180_v10 = vpack.c.bf16 %v23_v9, %v22_v8  ;;  %v29_v11 = vld [vmem:[%s1313_s0] sm:$0x3]  ;;  %s1120_s1 = smov 16   ;;  %v786_v17 = vld [vmem:[%s1313_s0 + $0x2] sm:$0x3]  ;;  %v26_v8 = vld [vmem:[%s1315_s2 + $0x10] sm:$0xff] }
   0x5   :  { %997 = vmatprep.subr.bf16.mxu0 %v1117_v3  ;;  %1006 = vmatprep.subr.bf16.mxu1 %v1117_v3  ;;  %v32_v12 = vsel %vm31_vm1, %v29_v11, 0.0  ;;  %v108_v16 = vmul.f32 0.05, %v29_v11  ;;  %v788_v25 = vld [vmem:[%s1313_s0 + $0x4] sm:$0x3]  ;;  %vm695_vm3 = vcmask 261120  }
   0x6   :  { %v790_v33 = vld [vmem:[%s1313_s0 + $0x6] sm:$0x3]  ;;  %v792_v41 = vld [vmem:[%s1313_s0 + $0x8] sm:$0x3]  ;;  %v794_v49 = vld [vmem:[%s1313_s0 + $0xa] sm:$0x3] }
   0x7   :  { %v111_v18 = vadd.f32 %v786_v17, %v108_v16  ;;  %v796_v57 = vld [vmem:[%s1313_s0 + $0xc] sm:$0x3]  ;;  %v798_v1 = vld [vmem:[%s1313_s0 + $0xe] sm:$0x3]  ;;  %s1121_s26 = smov [#allocation2]   ;;  %vm769_vm4 = vcmask 25600  }
   0x8   :  { %999 = vmatpush3.bf16.msra.mxu0 %v1168_v7  ;;  %1008 = vmatpush3.bf16.msra.mxu1 %v1168_v7  ;;  %s777_s27 = sshll.u32 %s1121_s26, 4  ;;  %s778_s27 = int_to_ptr.vmem [resolvable:$true] %s777_s27 }
   0x9   :  { %1000 = vmatprep.subr.bf16.mxu0 %v1117_v3  ;;  %1009 = vmatprep.subr.bf16.mxu1 %v1117_v3  ;;  %v191_v24 = vmul.f32 0.05, %v111_v18  ;;  %p1098_p1 = scmp.lt.s32.totalorder %s778_s27, %s778_s27 }
   0xb   :  { %v194_v26 = vadd.f32 %v788_v25, %v191_v24 }
   0xc   :  { %1002 = vmatpush3.bf16.msra.mxu0 %v1180_v10  ;;  %1011 = vmatpush3.bf16.msra.mxu1 %v1180_v10 }
   0xd   :  { %1012 = vmatprep.subr.bf16.mxu0 %v1117_v3  ;;  %1021 = vmatprep.subr.bf16.mxu1 %v1117_v3  ;;  %v274_v32 = vmul.f32 0.05, %v194_v26 }
   0xf   :  { %876 = vmatmul.mubr.msk.f32.vlgmr.msra.gmra.mrb[0].mxu0 %vm33_vm2, %v32_v12  ;;  %v277_v34 = vadd.f32 %v790_v33, %v274_v32 }
  0x10   :  { %1014 = vmatpush3.bf16.msra.mxu0 %v1157_v4  ;;  %905 = vmatprep.mubr.msk.f32.mxu0 %vm1118_vm0, %v1119_v6 }
  0x11   :  { %1015 = vmatprep.subr.bf16.mxu0 %v1117_v3  ;;  %v357_v40 = vmul.f32 0.05, %v277_v34 }
  0x13   :  { %v360_v42 = vadd.f32 %v792_v41, %v357_v40 }
  0x14   :  { %1017 = vmatpush3.bf16.msra.mxu0 %v1168_v7 }
  0x15   :  { %1018 = vmatprep.subr.bf16.mxu0 %v1117_v3  ;;  %v440_v48 = vmul.f32 0.05, %v360_v42 }
  0x17   :  { %v443_v50 = vadd.f32 %v794_v49, %v440_v48 }
  0x18   :  { %1020 = vmatpush3.bf16.msra.mxu0 %v1180_v10 }
  0x19   :  { %1030 = vmatprep.subr.bf16.mxu0 %v1117_v3  ;;  %v523_v56 = vmul.f32 0.05, %v443_v50 }
  0x1b   :  { %v526_v58 = vadd.f32 %v796_v57, %v523_v56 }
  0x1d   :  { %v606_v0 = vmul.f32 0.05, %v526_v58 }
  0x1f   :  { %v609_v2 = vadd.f32 %v798_v1, %v606_v0 }
  0xe2   :  { %v103_v13 = vpop.f32.mrb[0].mxu0 }
  0xe3   :  { %1077 = vtanh.f32 %v103_v13  ;;  %v877_v14 = vpop.f32.mrb[1].mxu0 }
  0xed   :  { %v1078_v15 = vpop.eup %1077 }
  0xee   :  { %113 = vrot.lane.b32.xlu0 %v1078_v15, %s1120_s1  ;;  %v800_v15 = vld [vmem:[%s1316_s3] ss:$0 sm:$0xff] }
 0x160   :  { %v114_v19 = vpop.permute.xlu0 %113 }
 0x161   :  { %v116_v20 = vsel %vm31_vm1, %v111_v18, %v114_v19 }
 0x162   :  { %891 = vmatmul.mubr.msk.f32.vlgmr.msra.gmra.mrb[0].mxu1 %vm33_vm2, %v116_v20 }
 0x163   :  { %1023 = vmatpush3.bf16.msra.mxu1 %v1157_v4  ;;  %920 = vmatprep.mubr.msk.f32.mxu1 %vm1118_vm0, %v1119_v6 }
 0x164   :  { %1024 = vmatprep.subr.bf16.mxu1 %v1117_v3 }
 0x167   :  { %1026 = vmatpush3.bf16.msra.mxu1 %v1168_v7 }
 0x168   :  { %1027 = vmatprep.subr.bf16.mxu1 %v1117_v3 }
 0x16b   :  { %1029 = vmatpush3.bf16.msra.mxu1 %v1180_v10 }
 0x16c   :  { %1039 = vmatprep.subr.bf16.mxu1 %v1117_v3 }
 0x235   :  { %v186_v21 = vpop.f32.mrb[0].mxu1 }
 0x236   :  { %1079 = vtanh.f32 %v186_v21  ;;  %v892_v22 = vpop.f32.mrb[1].mxu1 }
 0x240   :  { %v1080_v23 = vpop.eup %1079 }
 0x241   :  { %196 = vrot.lane.b32.xlu0 %v1080_v23, %s1120_s1 }
 0x2b3   :  { %v197_v27 = vpop.permute.xlu0 %196 }
 0x2b4   :  { %v199_v28 = vsel %vm31_vm1, %v194_v26, %v197_v27 }
 0x2b5   :  { %906 = vmatmul.mubr.msk.f32.vlgmr.msra.gmra.mrb[2].mxu0 %vm33_vm2, %v199_v28 }
 0x2b6   :  { %1032 = vmatpush3.bf16.msra.mxu0 %v1157_v4  ;;  %935 = vmatprep.mubr.msk.f32.mxu0 %vm1118_vm0, %v1119_v6 }
 0x2b7   :  { %1033 = vmatprep.subr.bf16.mxu0 %v1117_v3 }
 0x2ba   :  { %1035 = vmatpush3.bf16.msra.mxu0 %v1168_v7 }
 0x2bb   :  { %1036 = vmatprep.subr.bf16.mxu0 %v1117_v3 }
 0x2be   :  { %1038 = vmatpush3.bf16.msra.mxu0 %v1180_v10 }
 0x2bf   :  { %1048 = vmatprep.subr.bf16.mxu0 %v1117_v3 }
 0x388   :  { %v269_v29 = vpop.f32.mrb[2].mxu0 }
 0x389   :  { %1081 = vtanh.f32 %v269_v29  ;;  %v907_v30 = vpop.f32.mrb[3].mxu0 }
 0x393   :  { %v1082_v31 = vpop.eup %1081 }
 0x394   :  { %279 = vrot.lane.b32.xlu1 %v1082_v31, %s1120_s1 }
 0x406   :  { %v280_v35 = vpop.permute.xlu1 %279 }
 0x407   :  { %v282_v36 = vsel %vm31_vm1, %v277_v34, %v280_v35 }
 0x408   :  { %921 = vmatmul.mubr.msk.f32.vlgmr.msra.gmra.mrb[2].mxu1 %vm33_vm2, %v282_v36 }
 0x409   :  { %1041 = vmatpush3.bf16.msra.mxu1 %v1157_v4  ;;  %950 = vmatprep.mubr.msk.f32.mxu1 %vm1118_vm0, %v1119_v6 }
 0x40a   :  { %1042 = vmatprep.subr.bf16.mxu1 %v1117_v3 }
 0x40d   :  { %1044 = vmatpush3.bf16.msra.mxu1 %v1168_v7 }
 0x40e   :  { %1045 = vmatprep.subr.bf16.mxu1 %v1117_v3 }
 0x411   :  { %1047 = vmatpush3.bf16.msra.mxu1 %v1180_v10 }
 0x412   :  { %1057 = vmatprep.subr.bf16.mxu1 %v1117_v3 }
 0x4db   :  { %v352_v37 = vpop.f32.mrb[2].mxu1 }
 0x4dc   :  { %1083 = vtanh.f32 %v352_v37  ;;  %v922_v38 = vpop.f32.mrb[3].mxu1 }
 0x4e6   :  { %v1084_v39 = vpop.eup %1083 }
 0x4e7   :  { %362 = vrot.lane.b32.xlu1 %v1084_v39, %s1120_s1 }
 0x559   :  { %v363_v43 = vpop.permute.xlu1 %362 }
 0x55a   :  { %v365_v44 = vsel %vm31_vm1, %v360_v42, %v363_v43 }
 0x55b   :  { %936 = vmatmul.mubr.msk.f32.vlgmr.msra.gmra.mrb[4].mxu0 %vm33_vm2, %v365_v44 }
 0x55c   :  { %1050 = vmatpush3.bf16.msra.mxu0 %v1157_v4  ;;  %965 = vmatprep.mubr.msk.f32.mxu0 %vm1118_vm0, %v1119_v6 }
 0x55d   :  { %1051 = vmatprep.subr.bf16.mxu0 %v1117_v3 }
 0x560   :  { %1053 = vmatpush3.bf16.msra.mxu0 %v1168_v7 }
 0x561   :  { %1054 = vmatprep.subr.bf16.mxu0 %v1117_v3 }
 0x564   :  { %1056 = vmatpush3.bf16.msra.mxu0 %v1180_v10 }
 0x565   :  { %1066 = vmatprep.subr.bf16.mxu0 %v1117_v3 }
 0x62e   :  { %v435_v45 = vpop.f32.mrb[4].mxu0 }
 0x62f   :  { %1085 = vtanh.f32 %v435_v45  ;;  %v937_v46 = vpop.f32.mrb[5].mxu0 }
 0x639   :  { %v1086_v47 = vpop.eup %1085 }
 0x63a   :  { %445 = vrot.lane.b32.xlu0 %v1086_v47, %s1120_s1 }
 0x6ac   :  { %v446_v51 = vpop.permute.xlu0 %445 }
 0x6ad   :  { %v448_v52 = vsel %vm31_vm1, %v443_v50, %v446_v51 }
 0x6ae   :  { %951 = vmatmul.mubr.msk.f32.vlgmr.msra.gmra.mrb[4].mxu1 %vm33_vm2, %v448_v52 }
 0x6af   :  { %1059 = vmatpush3.bf16.msra.mxu1 %v1157_v4  ;;  %980 = vmatprep.mubr.msk.f32.mxu1 %vm1118_vm0, %v1119_v6 }
 0x6b0   :  { %1060 = vmatprep.subr.bf16.mxu1 %v1117_v3 }
 0x6b3   :  { %1062 = vmatpush3.bf16.msra.mxu1 %v1168_v7  ;;  %v25_v7 = vld [vmem:[%s1315_s2 + $0x8] sm:$0xff] }
 0x6b4   :  { %1063 = vmatprep.subr.bf16.mxu1 %v1117_v3 }
 0x6b7   :  { %1065 = vmatpush3.bf16.msra.mxu1 %v1180_v10  ;;  %v27_v10 = vld [vmem:[%s1315_s2 + $0x18] sm:$0xff] }
 0x6b8   :  { %v1070_v11 = vpack.c.bf16 %v27_v10, %v26_v8 }
 0x781   :  { %v518_v53 = vpop.f32.mrb[4].mxu1 }
 0x782   :  { %1087 = vtanh.f32 %v518_v53  ;;  %v952_v54 = vpop.f32.mrb[5].mxu1 }
 0x78c   :  { %v1088_v55 = vpop.eup %1087 }
 0x78d   :  { %528 = vrot.lane.b32.xlu1 %v1088_v55, %s1120_s1 }
 0x7ff   :  { %v529_v59 = vpop.permute.xlu1 %528 }
 0x800   :  { %v531_v60 = vsel %vm31_vm1, %v526_v58, %v529_v59 }
 0x801   :  { %966 = vmatmul.mubr.msk.f32.vlgmr.msra.gmra.mrb[6].mxu0 %vm33_vm2, %v531_v60 }
 0x802   :  { %991 = vmatprep.mubr.msk.f32.mxu0 %vm1118_vm0, %v1119_v6  ;;  %v24_v6 = vld [vmem:[%s1315_s2] sm:$0xff]  ;;  %s1093_s2 = scalar_lea.vmem %s778_s27, 32 }
 0x803   :  { %v1067_v9 = vpack.c.bf16 %v25_v7, %v24_v6  ;;  %p1094_p0 = scmp.ne.s32.totalorder %s778_s27, %s1093_s2  ;;  %p1099_p2 = scmp.lt.s32.totalorder %s1093_s2, %s1093_s2 }
 0x805   :  { %1068 = vmatpush3.bf16.msra.mxu0 %v1067_v9  ;;  %p1100_p3 = por %p1099_p2, %p1098_p1 }
 0x806   :  { %1069 = vmatprep.subr.bf16.mxu0 %v1117_v3 }
 0x807   :  { %p1101_p4 = pnand %p1100_p3, %p1094_p0 }
 0x809   :  { %1071 = vmatpush3.bf16.msra.mxu0 %v1070_v11 }
 0x8d4   :  { %v601_v61 = vpop.f32.mrb[6].mxu0 }
 0x8d5   :  { %1089 = vtanh.f32 %v601_v61  ;;  %v967_v62 = vpop.f32.mrb[7].mxu0 }
 0x8df   :  { %v1090_v63 = vpop.eup %1089 }
 0x8e0   :  { %611 = vrot.lane.b32.xlu0 %v1090_v63, %s1120_s1 }
 0x952   :  { %v612_v4 = vpop.permute.xlu0 %611 }
 0x953   :  { %v614_v5 = vsel %vm31_vm1, %v609_v2, %v612_v4 }
 0x954   :  { %981 = vmatmul.mubr.msk.f32.vlgmr.msra.gmra.mrb[6].mxu1 %vm33_vm2, %v614_v5 }
 0xa27   :  { %v684_v12 = vpop.f32.mrb[6].mxu1 }
 0xa28   :  { %1091 = vtanh.f32 %v684_v12  ;;  %v982_v13 = vpop.f32.mrb[7].mxu1 }
 0xa32   :  { %v1092_v14 = vpop.eup %1091 }
 0xa33   :  { %992 = vmatmul.mubr.msk.f32.vlgmr.msra.gmra.mrb[8].mxu0 %vm695_vm3, %v1092_v14 }
 0xb06   :  { %v765_v16 = vpop.f32.mrb[8].mxu0 }
 0xb07   :  { %v766_v17 = vadd.f32 %v800_v15, %v765_v16  ;;  %v993_v18 = vpop.f32.mrb[9].mxu0 }
 0xb09   :  { %770 = vst.msk [vmem:[#allocation2] sm:$0x3] %vm769_vm4, %v766_v17 }
 0xb0a   :  { %1104 = shalt.err (!%p1101_p4)
}
 0xb0b   :  { %s1105_s29 = scalar_lea.hbm %s1317_s4, 32 }
 0xb0c   :  { %p1106_p5 = scmp.ne.s32.totalorder %s1317_s4, %s1105_s29  ;;  %p1109_p6 = scmp.lt.u32.totalorder %s1105_s29, %s1317_s4 }
 0xb0e   :  { %p1111_p7 = pnand %p1109_p6, %p1106_p5 }
 0xb10   :  { %1114 = shalt.err (!%p1111_p7)
}
 0xb11   :  { %780 = dma.vmem_to_hbm [thread:$0]  %s778_s27, 32, %s1317_s4, [#allocation3]  }
 0xb12   :  { %1115 = dma.done.wait [#allocation3], 32  }
 0xb13   :  { %1116 = vsyncadd [#allocation3], 4294967264 }
 0xb14   :  { %784 = vsyncpa [#allocation3], 1 }

</bundles_post_ra>
